<compile_context>
chip_gen: v7x
topology: tpu7x:2x2x1
jax: 0.10.0
libtpu: 0.0.40
codegen_flags: <defaults>
</compile_context>

<pallas_src>
import jax
import jax.numpy as jnp
from jax.experimental import pallas as pl
from jax.experimental.pallas import tpu as pltpu

_TAN_3PI_8 = 2.414213562373095   # tan(3*pi/8)
_TAN_PI_8 = 0.4142135623730951   # tan(pi/8)
_PI_2 = 1.5707963267948966
_PI_4 = 0.7853981633974483


def _atan_sigmoid_kernel(x_ref, o_ref):
    x = x_ref[...].astype(jnp.float32)

    # ---------- arctan(x): Cephes atanf range reduction + polynomial ----------
    ax = jnp.abs(x)
    big = ax > _TAN_3PI_8          # |x| > tan(3pi/8): atan(|x|) = pi/2 + atan(-1/|x|)
    mid = ax > _TAN_PI_8           # tan(pi/8) < |x| <= tan(3pi/8): shift by pi/4

    # Single merged divide for all three branches (den >= 1 everywhere the
    # branch is selected, so no guard needed; inf/NaN inputs behave correctly).
    num = jnp.where(big, -1.0, jnp.where(mid, ax - 1.0, ax))
    den = jnp.where(big, ax, jnp.where(mid, ax + 1.0, 1.0))
    t = num / den
    offset = jnp.where(big, _PI_2, jnp.where(mid, _PI_4, 0.0))

    z = t * t
    poly = ((((8.05374449538e-2 * z - 1.38776856032e-1) * z
              + 1.99777106478e-1) * z - 3.33329491539e-1) * z) * t + t
    atan_abs = offset + poly
    atan_x = jnp.where(x < 0.0, -atan_abs, atan_abs)

    # ---------- sigmoid(x) = 0.5 + 0.5*tanh(0.5*x): one EUP op, no divide ----------
    sig = 0.5 + 0.5 * jnp.tanh(0.5 * x)

    o_ref[...] = (atan_x * sig).astype(o_ref.dtype)


def atan_sigmoid(x, *, target_block_bytes=2 * 1024 * 1024):
    """Elementwise f(x) = arctan(x) * sigmoid(x) on TPU via Pallas.

    Works for any shape / float dtype; I/O stays in the input dtype.
    """
    orig_shape = x.shape
    dtype = x.dtype
    lane = 128

    n = x.size
    if n == 0:
        return x

    itemsize = jnp.dtype(dtype).itemsize
    # Sublane packing: 8 rows/vreg for 32-bit, 16 for 16-bit, 32 for 8-bit.
    sublane = max(8, 32 // itemsize)

    rows = pl.cdiv(n, lane)
    n_lane_padded = rows * lane

    flat = x.reshape(-1)
    padded = n_lane_padded != n
    if padded:
        # Only when n is not a multiple of 128 (needed for the 2-D reshape).
        # TODO(synk): could be removed entirely with a scalar-prefetched
        # element count + masked pltpu.store on the final tile.
        flat = jnp.pad(flat, (0, n_lane_padded - n))
    x2d = flat.reshape(rows, lane)

    # ~2 MiB per buffer regardless of dtype; in+out double-buffered ~= 8 MiB
    # of VMEM -> fits every generation's default scoped VMEM with headroom.
    target_rows = max(sublane, target_block_bytes // (lane * itemsize))

    if rows > target_rows:
        block_rows = target_rows
    elif rows >= 2 * sublane:
        # Medium tensor: force >=2 grid steps so the "parallel" axis can
        # shard across both TensorCores on v7x (negligible cost elsewhere).
        half = pl.cdiv(rows, 2)
        block_rows = ((half + sublane - 1) // sublane) * sublane
    else:
        block_rows = rows            # tiny tensor: full-extent block (legal)

    grid = (pl.cdiv(rows, block_rows),)   # uneven final block masked by Pallas

    out2d = pl.pallas_call(
        _atan_sigmoid_kernel,
        out_shape=jax.ShapeDtypeStruct((rows, lane), dtype),
        grid=grid,
        in_specs=[pl.BlockSpec((block_rows, lane), lambda i: (i, 0))],
        out_specs=pl.BlockSpec((block_rows, lane), lambda i: (i, 0)),
        compiler_params=pltpu.CompilerParams(
            dimension_semantics=("parallel",)),
    )(x2d)

    out = out2d.reshape(-1)
    if padded:
        out = out[:n]
    return out.reshape(orig_shape)


if __name__ == "__main__":
    key = jax.random.PRNGKey(0)

    # NCHW activation map; scale by 3 so all three atan range-reduction
    # branches (|x| <= tan(pi/8), middle, |x| > tan(3pi/8)) are exercised.
    x = jax.random.normal(key, (2, 4, 16, 16), dtype=jnp.float32) * 3.0
    out = jax.block_until_ready(atan_sigmoid(x))
    ref = jnp.arctan(x) * jax.nn.sigmoid(x)
    assert out.shape == x.shape and out.dtype == x.dtype
    assert jnp.allclose(out, ref, atol=1e-5, rtol=1e-5)

    # Ragged (non-multiple-of-128) shape exercises the pad/slice fallback.
    x2 = jax.random.normal(jax.random.PRNGKey(1), (3, 5, 7), dtype=jnp.float32) * 3.0
    out2 = jax.block_until_ready(atan_sigmoid(x2))
    ref2 = jnp.arctan(x2) * jax.nn.sigmoid(x2)
    assert out2.shape == x2.shape and out2.dtype == x2.dtype
    assert jnp.allclose(out2, ref2, atol=1e-5, rtol=1e-5)

    print("KERNEL_OK")
</pallas_src>

<mosaic_0001>
module attributes {stable_mosaic.version = 11 : i64} {
  func.func @_atan_sigmoid_kernel(%arg0: i32, %arg1: memref<8x128xf32, #tpu.memory_space<vmem>>, %arg2: memref<8x128xf32, #tpu.memory_space<vmem>>) attributes {dimension_semantics = [#tpu.dimension_semantics<parallel>], iteration_bounds = array<i64: 2>, scalar_prefetch = 0 : i64, scratch_operands = 0 : i64, tpu.core_type = #tpu.core_type<tc>, window_params = [{transform_indices = @transform_0, window_bounds = array<i64: 8, 128>}, {transform_indices = @transform_1, window_bounds = array<i64: 8, 128>}]} {
    %c0 = arith.constant 0 : index
    %c0_0 = arith.constant 0 : index
    %0 = vector.load %arg1[%c0, %c0_0] : memref<8x128xf32, #tpu.memory_space<vmem>>, vector<8x128xf32>
    %1 = math.absf %0 : vector<8x128xf32>
    %cst = arith.constant 2.41421366 : f32
    %2 = vector.broadcast %cst : f32 to vector<8x128xf32>
    %3 = arith.cmpf ogt, %1, %2 : vector<8x128xf32>
    %cst_1 = arith.constant 0.414213568 : f32
    %4 = vector.broadcast %cst_1 : f32 to vector<8x128xf32>
    %5 = arith.cmpf ogt, %1, %4 : vector<8x128xf32>
    %cst_2 = arith.constant 1.000000e+00 : f32
    %6 = vector.broadcast %cst_2 : f32 to vector<8x128xf32>
    %7 = arith.subf %1, %6 : vector<8x128xf32>
    %8 = arith.select %5, %7, %1 : vector<8x128xi1>, vector<8x128xf32>
    %cst_3 = arith.constant -1.000000e+00 : f32
    %9 = vector.broadcast %cst_3 : f32 to vector<8x128xf32>
    %10 = arith.select %3, %9, %8 : vector<8x128xi1>, vector<8x128xf32>
    %cst_4 = arith.constant 1.000000e+00 : f32
    %11 = vector.broadcast %cst_4 : f32 to vector<8x128xf32>
    %12 = arith.addf %1, %11 : vector<8x128xf32>
    %cst_5 = arith.constant 1.000000e+00 : f32
    %13 = vector.broadcast %cst_5 : f32 to vector<8x128xf32>
    %14 = arith.select %5, %12, %13 : vector<8x128xi1>, vector<8x128xf32>
    %15 = arith.select %3, %1, %14 : vector<8x128xi1>, vector<8x128xf32>
    %16 = arith.divf %10, %15 : vector<8x128xf32>
    %cst_6 = arith.constant 0.785398185 : f32
    %cst_7 = arith.constant 0.000000e+00 : f32
    %17 = vector.broadcast %cst_6 : f32 to vector<8x128xf32>
    %18 = vector.broadcast %cst_7 : f32 to vector<8x128xf32>
    %19 = arith.select %5, %17, %18 : vector<8x128xi1>, vector<8x128xf32>
    %cst_8 = arith.constant 1.57079637 : f32
    %20 = vector.broadcast %cst_8 : f32 to vector<8x128xf32>
    %21 = arith.select %3, %20, %19 : vector<8x128xi1>, vector<8x128xf32>
    %22 = arith.mulf %16, %16 : vector<8x128xf32>
    %cst_9 = arith.constant 0.0805374458 : f32
    %23 = vector.broadcast %cst_9 : f32 to vector<8x128xf32>
    %24 = arith.mulf %23, %22 : vector<8x128xf32>
    %cst_10 = arith.constant 0.138776854 : f32
    %25 = vector.broadcast %cst_10 : f32 to vector<8x128xf32>
    %26 = arith.subf %24, %25 : vector<8x128xf32>
    %27 = arith.mulf %26, %22 : vector<8x128xf32>
    %cst_11 = arith.constant 0.199777111 : f32
    %28 = vector.broadcast %cst_11 : f32 to vector<8x128xf32>
    %29 = arith.addf %27, %28 : vector<8x128xf32>
    %30 = arith.mulf %29, %22 : vector<8x128xf32>
    %cst_12 = arith.constant 0.333329499 : f32
    %31 = vector.broadcast %cst_12 : f32 to vector<8x128xf32>
    %32 = arith.subf %30, %31 : vector<8x128xf32>
    %33 = arith.mulf %32, %22 : vector<8x128xf32>
    %34 = arith.mulf %33, %16 : vector<8x128xf32>
    %35 = arith.addf %34, %16 : vector<8x128xf32>
    %36 = arith.addf %21, %35 : vector<8x128xf32>
    %cst_13 = arith.constant 0.000000e+00 : f32
    %37 = vector.broadcast %cst_13 : f32 to vector<8x128xf32>
    %38 = arith.cmpf olt, %0, %37 : vector<8x128xf32>
    %cst_14 = arith.constant 0.000000e+00 : f32
    %39 = vector.broadcast %cst_14 : f32 to vector<8x128xf32>
    %40 = arith.subf %39, %36 : vector<8x128xf32>
    %41 = arith.select %38, %40, %36 : vector<8x128xi1>, vector<8x128xf32>
    %cst_15 = arith.constant 5.000000e-01 : f32
    %42 = vector.broadcast %cst_15 : f32 to vector<8x128xf32>
    %43 = arith.mulf %42, %0 : vector<8x128xf32>
    %44 = math.tanh %43 : vector<8x128xf32>
    %cst_16 = arith.constant 5.000000e-01 : f32
    %45 = vector.broadcast %cst_16 : f32 to vector<8x128xf32>
    %46 = arith.mulf %45, %44 : vector<8x128xf32>
    %cst_17 = arith.constant 5.000000e-01 : f32
    %47 = vector.broadcast %cst_17 : f32 to vector<8x128xf32>
    %48 = arith.addf %47, %46 : vector<8x128xf32>
    %49 = arith.mulf %41, %48 : vector<8x128xf32>
    %c0_18 = arith.constant 0 : index
    %c0_19 = arith.constant 0 : index
    %50 = vector.load %arg2[%c0_18, %c0_19] : memref<8x128xf32, #tpu.memory_space<vmem>>, vector<8x128xf32>
    tpu.vector_store %arg2[%c0_18, %c0_19], %49 {strides = array<i32>} : memref<8x128xf32, #tpu.memory_space<vmem>>, vector<8x128xf32>,
    return
  }
  func.func @transform_0(%arg0: i32) -> (i32, i32) {
    %c0_i32 = arith.constant 0 : i32
    %c0_i32_0 = arith.constant 0 : i32
    return %arg0, %c0_i32 : i32, i32
  }
  func.func @transform_1(%arg0: i32) -> (i32, i32) {
    %c0_i32 = arith.constant 0 : i32
    %c0_i32_0 = arith.constant 0 : i32
    return %arg0, %c0_i32 : i32, i32
  }
}

</mosaic_0001>

<bundles_post_ra>
// kernel: tpu_custom_call.1
= control target key start
LH: loop header
LB: loop body
LE: loop exit
PB: predicated region body
PF: predicated region fallthrough
CT: control target
= control target key end

     0   :  { %6 = vsyncpa [#allocation3], 0  ;;  %s598_s0 = inlined_call_operand.hbm [shape: f32[16,128], index: 0, kind: input, shape index: {}]   ;;  %s599_s1 = inlined_call_operand.hbm [shape: f32[16,128], index: 1, kind: output, shape index: {}]  }
   0x1   :  { %8 = vsyncpa [#allocation3 + $0x1], 0 }
   0x2   :  { %9 = vsyncpa [#allocation4], 0 }
   0x3   :  { %11 = vsyncpa [#allocation4 + $0x1], 0  ;;  %s427_s6 = smov 0   ;;  %s429_s7 = smov 0  }
   0x4   :  { %s431_s8 = smov 0   ;;  %s433_s9 = smov 0  }
   0x5 LB: > { %s448_s10 = sadd.s32 4294967295, %s412_s9   ;;  %s250_s11 = sadd.s32 4294967294, %s412_s9   ;;  %s412_s9 = sphi %s433_s9, %s614_s9   ;;  %s408_s8 = sphi %s431_s8, %s613_s8   ;;  %s404_s7 = sphi %s429_s7, %s612_s7   ;;  %s400_s6 = sphi %s427_s6, %s611_s6  }
   0x6   : > { %s452_s12 = sadd.s32 1, %s412_s9   ;;  %s24_s13 = sadd.s32 1, %s408_s8 }
   0x7   : > { %s21_s14 = ssub.s32 %s412_s9, %s452_s12  ;;  %p31_p0 = scmp.ne.s32.totalorder %s408_s8, %s404_s7 }
   0x8   : > { %p22_p1 = scmp.eq.s32.totalorder %s21_s14, 0  ;;  %p32_p2 = scmp.eq.s32.totalorder %s412_s9, 0 }
   0x9   : > { %p37_p3 = scmp.ne.s32.totalorder %s404_s7, %s400_s6  ;;  %p38_p4 = scmp.eq.s32.totalorder %s448_s10, 0 }
   0xa   : > { %s464_s15 = scalar_select %p22_p1, %s408_s8, %s24_s13  }
   0xb   : > { %p466_p5 = por %p32_p2, %p31_p0  ;;  %p470_p6 = por %p38_p4, %p37_p3 }
   0xc   : > { %p61_p7 = scmp.eq.s32.totalorder %s448_s10, 1  ;;  %p67_p8 = scmp.eq.s32.totalorder %s250_s11, 1 }
   0xd   : > { %p277_p10 = scmp.lt.s32.totalorder %s412_s9, 2  ;;  %s87_s20 = sand.u32 1, %s408_s8  }
   0xe   : > { %p477_p11 = por %p61_p7, %p31_p0  ;;  %p481_p12 = por %p67_p8, %p37_p3 }
   0xf   : > { %s254_s21 = sshll.u32 %s412_s9, 7  ;;  %s253_s22 = sshll.u32 %s87_s20, 3 }
  0x10   : > { %s603_s18 = scalar_select %p477_p11, 1, 0 }
  0x11   : > { %s604_s19 = scalar_select %p481_p12, 1, 0 }
  0x12   : > { %s490_s25 = scalar_lea.hbm %s598_s0, %s254_s21  ;;  %s91_s26 = scalar_lea.vmem [#allocation2], %s253_s22 }
  0x13   : > { %s98_s27 = sshll.u32 %s91_s26, 4  ;;  %p494_p13 = pnand %p277_p10, %p466_p5  ;;  %s498_s27 = int_to_ptr.vmem [resolvable:$true] %s98_s27 }
  0x14   : > { %s88_s29 = scalar_lea.sflag [#allocation3], %s87_s20  ;;  %s316_s30 = scalar_lea.hbm %s490_s25, 128 }
  0x15   : > { %p317_p2 = scmp.ne.s32.totalorder %s490_s25, %s316_s30  ;;  %p318_p3 = pneg %p494_p13 }
  0x16   : > { %s321_s4 = scalar_lea.hbm %s598_s0, 256  ;;  %p322_p5 = scmp.lt.u32.totalorder %s490_s25, %s598_s0 }
  0x17   : > { %p319_p4 = pnand %p318_p3, %p317_p2  ;;  %p323_p8 = scmp.lt.u32.totalorder %s321_s4, %s316_s30 }
  0x18   : > { %p325_p9 = scmp.lt.u32.totalorder %s316_s30, %s490_s25 }
  0x19   : > { %p320_p7 = pneg %p319_p4  ;;  %p324_p10 = por %p323_p8, %p322_p5 }
  0x1b   : > { %p326_p0 = por %p325_p9, %p324_p10 }
  0x1d   : > { %p327_p1 = pnand %p326_p0, %p320_p7 }
  0x1f   : > { %330 = shalt.err (!%p327_p1)
}
  0x20   : > { %s331_s13 = scalar_lea.vmem %s498_s27, 128  ;;  %s414_s14 = smov [#allocation2]  }
  0x21   : > { %p332_p2 = scmp.ne.s32.totalorder %s498_s27, %s331_s13  ;;  %s336_s16 = sshll.u32 %s414_s14, 4  ;;  %s337_s16 = int_to_ptr.vmem [resolvable:$false] %s336_s16 }
  0x22   : > { %s338_s20 = scalar_lea.vmem %s337_s16, 256  ;;  %p339_p11 = scmp.lt.s32.totalorder %s498_s27, %s337_s16 }
  0x23   : > { %p334_p4 = pnand %p332_p2, %p318_p3  ;;  %p340_p5 = scmp.lt.s32.totalorder %s338_s20, %s331_s13 }
  0x25   : > { %p335_p12 = pneg %p334_p4  ;;  %p341_p8 = por %p340_p5, %p339_p11 }
  0x27   : > { %p342_p9 = pnand %p341_p8, %p335_p12 }
  0x29   : > { %345 = shalt.err (!%p342_p9)
}
  0x2a   : > { %272 = dma.hbm_to_vmem [thread:$0]  (!%p494_p13), %s490_s25, 128, %s498_s27, %s88_s29  }
  0x2b   : > { %p606_p0 = scmp.lt.s32.totalorder %s412_s9, 3  ;;  %p607_p1 = scmp.ge.s32.totalorder %s412_s9, 1 }
  0x2d   : > { %p104_p3 = pnand %p607_p1, %p606_p0 }
  0x2e   : > { %s532_s21 = sand.u32 (!%p104_p3), 1, %s404_s7  }
  0x2f   : > { %107 = sbr.rel (%p104_p3) target bundleno = 116 (0x74), region = 24  ;;  %s256_s22 = sshll.u32 (!%p104_p3), %s532_s21, 3 }
  0x30   : > { %s110_s23 = scalar_lea.sflag (!%p104_p3), [#allocation3], %s532_s21  ;;  %s113_s24 = scalar_lea.vmem (!%p104_p3), [#allocation2], %s256_s22 }
  0x36   : > { %391 = dma.done.wait (%p470_p6), %s110_s23, 128  }
  0x37   : > { %393 = vsyncadd (%p470_p6), %s110_s23, 4294967168  ;;  %v132_v0 = vld [vmem:[%s113_s24] sm:$0xff]  ;;  %v415_v19 = vmov 0.0   ;;  %s131_s17 = scalar_lea.vmem [#allocation5], %s256_s22  ;;  %s262_s26 = sshll.u32 %s448_s10, 7 }
  0x38   : > { %v133_v1 = vand.u32 2147483647, %v132_v0  ;;  %v160_v11 = vmul.f32 0.5, %v132_v0  ;;  %vm157_vm2 = vcmp.lt.f32.partialorder %v132_v0, 0.0  ;;  %s180_s25 = sshll.u32 %s131_s17, 4  ;;  %s556_s29 = scalar_lea.hbm %s599_s1, %s262_s26  ;;  %s551_s25 = int_to_ptr.vmem [resolvable:$true] %s180_s25 }
  0x39   : > { %s167_s30 = scalar_lea.sflag [#allocation4], %s532_s21  ;;  %s346_s2 = scalar_lea.vmem %s551_s25, 128 }
  0x3a   : > { %vm134_vm0 = vcmp.gt.f32.partialorder %v133_v1, 2.4142137  ;;  %vm135_vm1 = vcmp.gt.f32.partialorder %v133_v1, 0.41421357  ;;  %v139_v2 = vadd.f32 1.0, %v133_v1  ;;  %v258_v5 = vadd.f32 -1.0, %v133_v1  ;;  %p347_p6 = scmp.ne.s32.totalorder %s551_s25, %s346_s2 }
  0x3b   : > { %v144_v20 = vsel %vm135_vm1, 0.7853982, %v415_v19  ;;  %p608_p11 = scmp.ne.s32.totalorder %s603_s18, 0  ;;  %s416_s10 = smov [#allocation5]  }
  0x3c   : > { %v140_v3 = vsel %vm135_vm1, %v139_v2, 1.0  ;;  %v137_v6 = vsel %vm135_vm1, %v258_v5, %v133_v1  ;;  %v145_v23 = vsel %vm134_vm0, 1.5707964, %v144_v20  ;;  %s350_s3 = sshll.u32 %s416_s10, 4  ;;  %s351_s3 = int_to_ptr.vmem [resolvable:$false] %s350_s3 }
  0x3d   : > { %v141_v4 = vsel %vm134_vm0, %v133_v1, %v140_v3  ;;  %v138_v7 = vsel %vm134_vm0, -1.0, %v137_v6  ;;  %p348_p12 = pnand %p347_p6, %p608_p11  ;;  %s352_s4 = scalar_lea.vmem %s351_s3, 256 }
  0x3e   : > { %312 = vrcp.f32 %v141_v4  ;;  %p353_p7 = scmp.lt.s32.totalorder %s551_s25, %s351_s3  ;;  %p354_p10 = scmp.lt.s32.totalorder %s352_s4, %s346_s2 }
  0x3f   : > { %314 = vtanh.f32 %v160_v11  ;;  %p349_p13 = pneg %p348_p12 }
  0x40   : > { %p355_p2 = por %p354_p10, %p353_p7 }
  0x42   : > { %p356_p4 = pnand %p355_p2, %p349_p13 }
  0x48   : > { %v313_v8 = vpop.eup %312 }
  0x49   : > { %v143_v9 = vmul.f32 %v313_v8, %v138_v7  ;;  %v315_v18 = vpop.eup %314 }
  0x4a   : > { %v162_v24 = vmul.f32 0.5, %v315_v18 }
  0x4b   : > { %v146_v10 = vmul.f32 %v143_v9, %v143_v9 }
  0x4c   : > { %v163_v27 = vadd.f32 0.5, %v162_v24 }
  0x4d   : > { %v147_v12 = vmul.f32 0.080537446, %v146_v10 }
  0x4f   : > { %v259_v13 = vadd.f32 -0.13877685, %v147_v12 }
  0x51   : > { %v149_v14 = vmul.f32 %v259_v13, %v146_v10 }
  0x53   : > { %v150_v15 = vadd.f32 0.19977711, %v149_v14 }
  0x55   : > { %v151_v16 = vmul.f32 %v150_v15, %v146_v10 }
  0x57   : > { %v260_v17 = vadd.f32 -0.3333295, %v151_v16 }
  0x59   : > { %v153_v21 = vmul.f32 %v260_v17, %v146_v10 }
  0x5b   : > { %v154_v22 = vmul.f32 %v153_v21, %v143_v9 }
  0x5d   : > { %v155_v25 = vadd.f32 %v154_v22, %v143_v9 }
  0x5f   : > { %v156_v26 = vadd.f32 %v155_v25, %v145_v23 }
  0x61   : > { %v158_v28 = vsub.f32 0.0, %v156_v26 }
  0x63   : > { %v159_v29 = vsel %vm157_vm2, %v158_v28, %v156_v26 }
  0x64   : > { %v164_v30 = vmul.f32 %v163_v27, %v159_v29 }
  0x66   : > { %165 = vst [vmem:[%s131_s17] sm:$0xff] %v164_v30 }
  0x67   : > { %359 = shalt.err (!%p356_p4)
}
  0x68   : > { %s360_s5 = scalar_lea.hbm %s556_s29, 128  ;;  %s364_s14 = scalar_lea.hbm %s599_s1, 256 }
  0x69   : > { %p361_p5 = scmp.ne.s32.totalorder %s556_s29, %s360_s5  ;;  %p365_p0 = scmp.lt.u32.totalorder %s556_s29, %s599_s1 }
  0x6a   : > { %p366_p1 = scmp.lt.u32.totalorder %s364_s14, %s360_s5  ;;  %p368_p6 = scmp.lt.u32.totalorder %s360_s5, %s556_s29 }
  0x6b   : > { %p362_p8 = pnand %p361_p5, %p608_p11 }
  0x6c   : > { %p367_p3 = por %p366_p1, %p365_p0 }
  0x6d   : > { %p363_p9 = pneg %p362_p8 }
  0x6e   : > { %p369_p12 = por %p368_p6, %p367_p3 }
  0x70   : > { %p370_p13 = pnand %p369_p12, %p363_p9 }
  0x72   : > { %373 = shalt.err (!%p370_p13)
}
  0x73   : > { %267 = dma.vmem_to_hbm [thread:$0]  (%p608_p11), %s551_s25, 128, %s556_s29, %s167_s30  }
  0x74 PF: > { %s192_s21 = sand.u32 1, %s400_s6   ;;  %p609_p7 = scmp.ne.s32.totalorder %s604_s19, 0 }
  0x75   : > { %p610_p10 = scmp.ge.s32.totalorder %s412_s9, 2  ;;  %s193_s22 = scalar_lea.sflag [#allocation4], %s192_s21 }
  0x77   : > { %p274_p2 = pnand %p610_p10, %p609_p7 }
  0x79   : > { %395 = dma.done.wait (!%p274_p2), %s193_s22, 128  }
  0x7a   : > { %397 = vsyncadd (!%p274_p2), %s193_s22, 4294967168  ;;  %p14_p4 = scmp.ge.s32.totalorder %s452_s12, 4   ;;  %s611_s6 = smov %s404_s7 }
  0x7b   : > { %s612_s7 = smov %s408_s8  ;;  %s613_s8 = smov %s464_s15 }
  0x7c   : > { %s614_s9 = smov %s452_s12  ;;  %16 = sbr.rel (!%p14_p4) target bundleno = 5 (0x5), region = 69 }
  0x83   :  { %198 = vsyncpa [#allocation3], 1 }
  0x84   :  { %200 = vsyncpa [#allocation3 + $0x1], 1 }
  0x85   :  { %201 = vsyncpa [#allocation4], 1 }
  0x86   :  { %203 = vsyncpa [#allocation4 + $0x1], 1 }

</bundles_post_ra>
